<compile_context>
chip_gen: v7x
topology: tpu7x:2x2x1
jax: 0.10.0
libtpu: 0.0.40
codegen_flags: <defaults>
</compile_context>

<pallas_src>
import functools

import jax
import jax.numpy as jnp
from jax.experimental import pallas as pl
from jax.experimental.pallas import tpu as pltpu


OUT_DIM = 8     # fixed by RCCModule: nn.Linear(input_dim, 8)
OUT_PAD = 128   # MXU-native N for the second matmul (zero-padded columns)


def _round_up(n, m):
    return (n + m - 1) // m * m


def _cdiv(a, b):
    return (a + b - 1) // b


def _rcc_kernel(x_ref, w1_ref, b1_ref, w2_ref, b2_ref, o_ref):
    # In-kernel f32 -> bf16 cast of the x tile (rides free VALU slots).
    xt = x_ref[...].astype(jnp.bfloat16)
    # Hidden layer: (tb, D) @ (D, D) on the MXU, f32 accumulation.
    h = jnp.dot(xt, w1_ref[...], preferred_element_type=jnp.float32)
    h = jnp.maximum(h + b1_ref[...], 0.0)          # bias + ReLU in f32 (VPU)
    # Output layer at MXU-native N=128 (W2/b2 zero-padded to 128 lanes).
    out = jnp.dot(h.astype(w2_ref.dtype), w2_ref[...],
                  preferred_element_type=jnp.float32)
    out = out + b2_ref[...]
    # Store only the real columns: HBM writeback is exactly (tb, 8) f32.
    o_ref[...] = out[:, :o_ref.shape[1]].astype(o_ref.dtype)


@functools.partial(jax.jit, static_argnames=("tile_b",))
def rcc_forward(x, w1, b1, w2, b2, *, tile_b=2048):
    """RCCModule forward: relu(x @ w1 + b1) @ w2 + b2.

    x:  (B, D) f32
    w1: (D, D), b1: (1, D)       first Linear, stored as (in, out) = W.T
    w2: (D, 8), b2: (1, 8)       second Linear, stored as (in, out) = W.T
    returns (B, 8) f32
    """
    B, D = x.shape
    out_dim = w2.shape[1]
    assert out_dim <= OUT_PAD

    # Batch tile: multiple of 16 rows (bf16 sublane packing), VMEM-safe cap,
    # and keep >=2 grid steps (v7x megacore) whenever the batch allows it.
    tb = max(16, _round_up(min(tile_b, B), 16))
    tb = min(tb, 4096)
    if B > 16 and _cdiv(B, tb) < 2:
        tb = max(16, _round_up(_cdiv(B, 2), 16))
    grid = (_cdiv(B, tb),)

    # One-time, tiny parameter prep (weights are ~66 KiB; x stays untouched in HBM).
    w1b = w1.astype(jnp.bfloat16)
    w2b = jnp.pad(w2.astype(jnp.bfloat16), ((0, 0), (0, OUT_PAD - out_dim)))
    b1f = b1.astype(jnp.float32)
    b2p = jnp.pad(b2.astype(jnp.float32), ((0, 0), (0, OUT_PAD - out_dim)))

    return pl.pallas_call(
        _rcc_kernel,
        out_shape=jax.ShapeDtypeStruct((B, out_dim), jnp.float32),
        grid_spec=pltpu.PrefetchScalarGridSpec(
            num_scalar_prefetch=0,
            grid=grid,
            in_specs=[
                pl.BlockSpec((tb, D), lambda i: (i, 0)),        # x: pipelined f32 tiles
                pl.BlockSpec((D, D), lambda i: (0, 0)),         # W1: resident
                pl.BlockSpec((1, D), lambda i: (0, 0)),         # b1: resident
                pl.BlockSpec((D, OUT_PAD), lambda i: (0, 0)),   # W2 (padded): resident
                pl.BlockSpec((1, OUT_PAD), lambda i: (0, 0)),   # b2 (padded): resident
            ],
            out_specs=pl.BlockSpec((tb, out_dim), lambda i: (i, 0)),
        ),
        compiler_params=pltpu.CompilerParams(
            dimension_semantics=("parallel",),      # megacore split on v7x
            vmem_limit_bytes=32 * 1024 * 1024,      # explicit budget (v7x-safe)
        ),
    )(x, w1b, b1f, w2b, b2p)


if __name__ == "__main__":
    # Small shapes: D=128 matches the MXU/lane width; B=512 -> a 2-step batch grid.
    B, D = 512, 128

    key = jax.random.PRNGKey(0)
    kx, k1, k2, k3, k4 = jax.random.split(key, 5)

    x = jax.random.normal(kx, (B, D), dtype=jnp.float32)

    # Deterministic parameters (shapes from nn.Linear(D, D) and nn.Linear(D, 8)),
    # stored as (in, out) = W.T relative to PyTorch's (out, in) layout.
    scale1 = 1.0 / jnp.sqrt(D)
    w1 = jax.random.uniform(k1, (D, D), jnp.float32, -scale1, scale1)
    b1 = jax.random.uniform(k2, (1, D), jnp.float32, -scale1, scale1)
    w2 = jax.random.uniform(k3, (D, OUT_DIM), jnp.float32, -scale1, scale1)
    b2 = jax.random.uniform(k4, (1, OUT_DIM), jnp.float32, -scale1, scale1)

    y = jax.block_until_ready(rcc_forward(x, w1, b1, w2, b2))
    assert y.shape == (B, OUT_DIM)

    # Pure-JAX reference with the same bf16-operand / f32-accumulate semantics.
    xb = x.astype(jnp.bfloat16)
    h_ref = jnp.maximum(
        jnp.dot(xb, w1.astype(jnp.bfloat16),
                preferred_element_type=jnp.float32) + b1, 0.0)
    y_ref = jnp.dot(h_ref.astype(jnp.bfloat16), w2.astype(jnp.bfloat16),
                    preferred_element_type=jnp.float32) + b2
    max_err = float(jnp.max(jnp.abs(y - y_ref)))
    assert jnp.allclose(y, y_ref, atol=5e-3, rtol=5e-3), max_err

    print("KERNEL_OK")
</pallas_src>

<mosaic_0001>
module attributes {stable_mosaic.version = 11 : i64} {
  func.func @_rcc_kernel(%arg0: i32, %arg1: memref<256x128xf32, #tpu.memory_space<vmem>>, %arg2: memref<128x128xbf16, #tpu.memory_space<vmem>>, %arg3: memref<1x128xf32, #tpu.memory_space<vmem>>, %arg4: memref<128x128xbf16, #tpu.memory_space<vmem>>, %arg5: memref<1x128xf32, #tpu.memory_space<vmem>>, %arg6: memref<256x8xf32, #tpu.memory_space<vmem>>) attributes {dimension_semantics = [#tpu.dimension_semantics<parallel>], iteration_bounds = array<i64: 2>, scalar_prefetch = 0 : i64, scratch_operands = 0 : i64, tpu.core_type = #tpu.core_type<tc>, window_params = [{transform_indices = @transform_0, window_bounds = array<i64: 256, 128>}, {pipeline_mode = #tpu.pipeline_mode<synchronous>, transform_indices = @transform_1, window_bounds = array<i64: 128, 128>}, {pipeline_mode = #tpu.pipeline_mode<synchronous>, transform_indices = @transform_2, window_bounds = array<i64: 1, 128>}, {pipeline_mode = #tpu.pipeline_mode<synchronous>, transform_indices = @transform_3, window_bounds = array<i64: 128, 128>}, {pipeline_mode = #tpu.pipeline_mode<synchronous>, transform_indices = @transform_4, window_bounds = array<i64: 1, 128>}, {transform_indices = @transform_5, window_bounds = array<i64: 256, 8>}]} {
    %c0 = arith.constant 0 : index
    %c0_0 = arith.constant 0 : index
    %0 = vector.load %arg1[%c0, %c0_0] : memref<256x128xf32, #tpu.memory_space<vmem>>, vector<256x128xf32>
    %1 = arith.truncf %0 : vector<256x128xf32> to vector<256x128xbf16>
    %c0_1 = arith.constant 0 : index
    %c0_2 = arith.constant 0 : index
    %2 = vector.load %arg2[%c0_1, %c0_2] : memref<128x128xbf16, #tpu.memory_space<vmem>>, vector<128x128xbf16>
    %cst = arith.constant dense<0.000000e+00> : vector<256x128xf32>
    %3 = tpu.matmul %1, %2, %cst {dimension_numbers = #tpu.dot_dimension_numbers<[1], [0], [0], [1], [0, 0, 1, 1], [], []>} : vector<256x128xbf16>, vector<128x128xbf16>, vector<256x128xf32> -> vector<256x128xf32>
    %c0_3 = arith.constant 0 : index
    %c0_4 = arith.constant 0 : index
    %4 = vector.load %arg3[%c0_3, %c0_4] : memref<1x128xf32, #tpu.memory_space<vmem>>, vector<1x128xf32>
    %5 = vector.broadcast %4 : vector<1x128xf32> to vector<256x128xf32>
    %6 = arith.addf %3, %5 : vector<256x128xf32>
    %cst_5 = arith.constant 0.000000e+00 : f32
    %7 = vector.broadcast %cst_5 : f32 to vector<256x128xf32>
    %8 = arith.maximumf %6, %7 : vector<256x128xf32>
    %9 = arith.truncf %8 : vector<256x128xf32> to vector<256x128xbf16>
    %c0_6 = arith.constant 0 : index
    %c0_7 = arith.constant 0 : index
    %10 = vector.load %arg4[%c0_6, %c0_7] : memref<128x128xbf16, #tpu.memory_space<vmem>>, vector<128x128xbf16>
    %cst_8 = arith.constant dense<0.000000e+00> : vector<256x128xf32>
    %11 = tpu.matmul %9, %10, %cst_8 {dimension_numbers = #tpu.dot_dimension_numbers<[1], [0], [0], [1], [0, 0, 1, 1], [], []>} : vector<256x128xbf16>, vector<128x128xbf16>, vector<256x128xf32> -> vector<256x128xf32>
    %c0_9 = arith.constant 0 : index
    %c0_10 = arith.constant 0 : index
    %12 = vector.load %arg5[%c0_9, %c0_10] : memref<1x128xf32, #tpu.memory_space<vmem>>, vector<1x128xf32>
    %13 = vector.broadcast %12 : vector<1x128xf32> to vector<256x128xf32>
    %14 = arith.addf %11, %13 : vector<256x128xf32>
    %15 = vector.extract_strided_slice %14 {offsets = [0, 0], sizes = [256, 8], strides = [1, 1]} : vector<256x128xf32> to vector<256x8xf32>
    %c0_11 = arith.constant 0 : index
    %c0_12 = arith.constant 0 : index
    %16 = vector.load %arg6[%c0_11, %c0_12] : memref<256x8xf32, #tpu.memory_space<vmem>>, vector<256x8xf32>
    tpu.vector_store %arg6[%c0_11, %c0_12], %15 {strides = array<i32>} : memref<256x8xf32, #tpu.memory_space<vmem>>, vector<256x8xf32>,
    return
  }
  func.func @transform_0(%arg0: i32) -> (i32, i32) {
    %c0_i32 = arith.constant 0 : i32
    %c0_i32_0 = arith.constant 0 : i32
    return %arg0, %c0_i32 : i32, i32
  }
  func.func @transform_1(%arg0: i32) -> (i32, i32) {
    %c0_i32 = arith.constant 0 : i32
    %c0_i32_0 = arith.constant 0 : i32
    %c0_i32_1 = arith.constant 0 : i32
    return %c0_i32, %c0_i32_0 : i32, i32
  }
  func.func @transform_2(%arg0: i32) -> (i32, i32) {
    %c0_i32 = arith.constant 0 : i32
    %c0_i32_0 = arith.constant 0 : i32
    %c0_i32_1 = arith.constant 0 : i32
    return %c0_i32, %c0_i32_0 : i32, i32
  }
  func.func @transform_3(%arg0: i32) -> (i32, i32) {
    %c0_i32 = arith.constant 0 : i32
    %c0_i32_0 = arith.constant 0 : i32
    %c0_i32_1 = arith.constant 0 : i32
    return %c0_i32, %c0_i32_0 : i32, i32
  }
  func.func @transform_4(%arg0: i32) -> (i32, i32) {
    %c0_i32 = arith.constant 0 : i32
    %c0_i32_0 = arith.constant 0 : i32
    %c0_i32_1 = arith.constant 0 : i32
    return %c0_i32, %c0_i32_0 : i32, i32
  }
  func.func @transform_5(%arg0: i32) -> (i32, i32) {
    %c0_i32 = arith.constant 0 : i32
    %c0_i32_0 = arith.constant 0 : i32
    return %arg0, %c0_i32 : i32, i32
  }
}

</mosaic_0001>

<bundles_post_ra>
// kernel: rcc_forward.1
= control target key start
LH: loop header
LB: loop body
LE: loop exit
PB: predicated region body
PF: predicated region fallthrough
CT: control target
= control target key end

     0   :  { %10 = vsyncpa [#allocation3], 0  ;;  %s1569_s0 = inlined_call_operand.hbm [shape: f32[512,128], index: 0, kind: input, shape index: {}]   ;;  %s1570_s1 = inlined_call_operand.vmem [shape: bf16[128,128], index: 1, kind: input, shape index: {}]   ;;  %s1571_s2 = inlined_call_operand.vmem [shape: f32[1,128], index: 2, kind: input, shape index: {}]   ;;  %s1572_s3 = inlined_call_operand.vmem [shape: bf16[128,128], index: 3, kind: input, shape index: {}]   ;;  %s1573_s4 = inlined_call_operand.vmem [shape: f32[1,128], index: 4, kind: input, shape index: {}]   ;;  %s1574_s5 = inlined_call_operand.vmem [shape: f32[512,8], index: 5, kind: output, shape index: {}]  }
   0x1   :  { %12 = vsyncpa [#allocation3 + $0x1], 0  ;;  %s1240_s18 = smov 0   ;;  %s1242_s19 = smov 0  }
   0x2   :  { %s1244_s20 = smov 0   ;;  %s1246_s21 = smov 0  }
   0x3 LB: > { %s908_s22 = sadd.s32 4294967295, %s1205_s21   ;;  %s1260_s23 = sadd.s32 1, %s1205_s21   ;;  %s1205_s21 = sphi %s1246_s21, %s1581_s21   ;;  %s1201_s20 = sphi %s1244_s20, %s1580_s20   ;;  %s1197_s19 = sphi %s1242_s19, %s1579_s19   ;;  %s1193_s18 = sphi %s1240_s18, %s1578_s18  }
   0x4   : > { %s22_s24 = ssub.s32 %s1205_s21, %s1260_s23  ;;  %s25_s25 = sadd.s32 1, %s1201_s20 }
   0x5   : > { %p23_p0 = scmp.eq.s32.totalorder %s22_s24, 0  ;;  %p32_p1 = scmp.ne.s32.totalorder %s1201_s20, %s1197_s19 }
   0x6   : > { %p33_p2 = scmp.eq.s32.totalorder %s1205_s21, 0  ;;  %p38_p3 = scmp.ne.s32.totalorder %s1197_s19, %s1193_s18 }
   0x7   : > { %s1270_s26 = scalar_select %p23_p0, %s1201_s20, %s25_s25  }
   0x8   : > { %p34_p4 = por %p33_p2, %p32_p1  ;;  %p39_p5 = scmp.eq.s32.totalorder %s908_s22, 0 }
   0x9   : > { %p1090_p6 = scmp.lt.s32.totalorder %s1205_s21, 2  ;;  %s184_s28 = sand.u32 1, %s1201_s20  }
   0xa   : > { %p1275_p7 = por %p39_p5, %p38_p3  ;;  %s912_s29 = sshll.u32 %s184_s28, 8 }
   0xb   : > { %s939_s30 = sshll.u32 %s1205_s21, 12  ;;  %s188_s9 = scalar_lea.vmem [#allocation2], %s912_s29 }
   0xc   : > { %s1284_s8 = scalar_lea.hbm %s1569_s0, %s939_s30  ;;  %s195_s10 = sshll.u32 %s188_s9, 4  ;;  %s1286_s10 = int_to_ptr.vmem [resolvable:$true] %s195_s10 }
   0xd   : > { %p1288_p8 = pnand %p1090_p6, %p34_p4  ;;  %s1293_s12 = scalar_lea.sflag [#allocation3], %s184_s28 }
   0xe   : > { %s1141_s13 = scalar_lea.hbm %s1284_s8, 4096  ;;  %s1146_s16 = scalar_lea.hbm %s1569_s0, 8192 }
   0xf   : > { %p1142_p10 = scmp.ne.s32.totalorder %s1284_s8, %s1141_s13  ;;  %p1143_p11 = pneg %p1288_p8 }
  0x10   : > { %p1147_p0 = scmp.lt.u32.totalorder %s1284_s8, %s1569_s0  ;;  %p1148_p1 = scmp.lt.u32.totalorder %s1146_s16, %s1141_s13 }
  0x11   : > { %p1144_p12 = pnand %p1143_p11, %p1142_p10  ;;  %p1150_p3 = scmp.lt.u32.totalorder %s1141_s13, %s1284_s8 }
  0x12   : > { %p1149_p2 = por %p1148_p1, %p1147_p0 }
  0x13   : > { %p1145_p13 = pneg %p1144_p12 }
  0x14   : > { %p1151_p4 = por %p1150_p3, %p1149_p2 }
  0x16   : > { %p1152_p5 = pnand %p1151_p4, %p1145_p13 }
  0x18   : > { %1155 = shalt.err (!%p1152_p5)
}
  0x19   : > { %s1156_s24 = scalar_lea.vmem %s1286_s10, 4096  ;;  %s1207_s25 = smov [#allocation2]  }
  0x1a   : > { %p1157_p6 = scmp.ne.s32.totalorder %s1286_s10, %s1156_s24  ;;  %s1161_s28 = sshll.u32 %s1207_s25, 4  ;;  %s1162_s28 = int_to_ptr.vmem [resolvable:$false] %s1161_s28 }
  0x1b   : > { %s1163_s29 = scalar_lea.vmem %s1162_s28, 8192  ;;  %p1164_p9 = scmp.lt.s32.totalorder %s1286_s10, %s1162_s28 }
  0x1c   : > { %p1159_p10 = pnand %p1157_p6, %p1143_p11  ;;  %p1165_p0 = scmp.lt.s32.totalorder %s1163_s29, %s1156_s24 }
  0x1e   : > { %p1160_p12 = pneg %p1159_p10  ;;  %p1166_p1 = por %p1165_p0, %p1164_p9 }
  0x20   : > { %p1167_p2 = pnand %p1166_p1, %p1160_p12 }
  0x22   : > { %1170 = shalt.err (!%p1167_p2)
}
  0x23   : > { %s1208_s30 = smov 128   ;;  %s1209_s6 = smov 8  }
  0x24   : > { %1089 = dma.hbm_to_vmem [thread:$0]  (!%p1288_p8), %s1284_s8, 4096, %s1286_s10, %s1293_s12, %s1208_s30, %s1208_s30, %s1209_s6  }
  0x25   : > { %p203_p11 = scmp.lt.s32.totalorder %s1205_s21, 3  ;;  %p1577_p13 = scmp.ge.s32.totalorder %s1205_s21, 1 }
  0x27   : > { %p204_p3 = pnand %p1577_p13, %p203_p11 }
  0x28   : > { %s209_s7 = sand.u32 (!%p204_p3), 1, %s1197_s19  }
  0x29   : > { %207 = sbr.rel (%p204_p3) target bundleno = 578 (0x242), region = 40  ;;  %s916_s9 = sshll.u32 (!%p204_p3), %s209_s7, 8 }
  0x2a   : > { %s210_s13 = scalar_lea.sflag (!%p204_p3), [#allocation3], %s209_s7  ;;  %s1325_s14 = scalar_lea.vmem (!%p204_p3), [#allocation2], %s916_s9 }
  0x30   : > { %1188 = dma.done.wait (%p1275_p7), %s210_s13, 4096  }
  0x31   : > { %1190 = vsyncadd (%p1275_p7), %s210_s13, 4294963200  ;;  %v1125_v0 = vld [vmem:[%s1570_s1] sm:$0xff]   ;;  %v1126_v1 = vld [vmem:[%s1570_s1 + $0x8] sm:$0xff]   ;;  %vm808_vm0 = vcmask 64512  }
  0x32   : > { %988 = vmatprep.subr.bf16.mxu0 %v1125_v0  ;;  %v1127_v2 = vld [vmem:[%s1570_s1 + $0x10] sm:$0xff]   ;;  %v1128_v3 = vld [vmem:[%s1570_s1 + $0x18] sm:$0xff]   ;;  %v248_v4 = vld [vmem:[%s1325_s14] sm:$0xff] }
  0x33   : > { %989 = vmatpush3.bf16.msra.mxu0 %v1125_v0  ;;  %v249_v5 = vld [vmem:[%s1325_s14 + $0x8] sm:$0xff]  ;;  %v1129_v7 = vld [vmem:[%s1570_s1 + $0x20] sm:$0xff]   ;;  %v1131_v9 = vld [vmem:[%s1570_s1 + $0x30] sm:$0xff]  }
  0x34   : > { %990 = vmatprep.subr.bf16.mxu0 %v1126_v1  ;;  %v280_v6 = vpack.c.bf16 %v249_v5, %v248_v4  ;;  %v1130_v8 = vld [vmem:[%s1570_s1 + $0x28] sm:$0xff]   ;;  %v1133_v10 = vld [vmem:[%s1572_s3] sm:$0xff]   ;;  %v1135_v12 = vld [vmem:[%s1572_s3 + $0x10] sm:$0xff]  }
  0x35   : > { %v1134_v11 = vld [vmem:[%s1572_s3 + $0x8] sm:$0xff]   ;;  %1036 = vmatprep.subr.bf16.mxu1 %v1133_v10  ;;  %v1132_v13 = vld [vmem:[%s1570_s1 + $0x38] sm:$0xff]   ;;  %v250_v14 = vld [vmem:[%s1325_s14 + $0x10] sm:$0xff] }
  0x36   : > { %1004 = vmatprep.mubr.bf16.mxu0 %v280_v6  ;;  %1037 = vmatpush3.bf16.msra.mxu1 %v1133_v10  ;;  %v251_v15 = vld [vmem:[%s1325_s14 + $0x18] sm:$0xff]  ;;  %v252_v17 = vld [vmem:[%s1325_s14 + $0x20] sm:$0xff]  ;;  %v253_v18 = vld [vmem:[%s1325_s14 + $0x28] sm:$0xff] }
  0x37   : > { %991 = vmatpush3.bf16.msra.mxu0 %v1126_v1  ;;  %1038 = vmatprep.subr.bf16.mxu1 %v1134_v11  ;;  %v1136_v16 = vld [vmem:[%s1572_s3 + $0x18] sm:$0xff]   ;;  %v281_v19 = vpack.c.bf16 %v251_v15, %v250_v14  ;;  %v282_v20 = vpack.c.bf16 %v253_v18, %v252_v17  ;;  %v1137_v21 = vld [vmem:[%s1572_s3 + $0x20] sm:$0xff]   ;;  %v254_v22 = vld [vmem:[%s1325_s14 + $0x30] sm:$0xff] }
  0x38   : > { %992 = vmatprep.subr.bf16.mxu0 %v1127_v2  ;;  %v255_v23 = vld [vmem:[%s1325_s14 + $0x38] sm:$0xff]  ;;  %v1138_v24 = vld [vmem:[%s1572_s3 + $0x28] sm:$0xff]   ;;  %v256_v25 = vld [vmem:[%s1325_s14 + $0x40] sm:$0xff] }
  0x39   : > { %v257_v26 = vld [vmem:[%s1325_s14 + $0x48] sm:$0xff]  ;;  %v283_v27 = vpack.c.bf16 %v255_v23, %v254_v22  ;;  %v258_v29 = vld [vmem:[%s1325_s14 + $0x50] sm:$0xff]  ;;  %v259_v30 = vld [vmem:[%s1325_s14 + $0x58] sm:$0xff] }
  0x3a   : > { %1039 = vmatpush3.bf16.msra.mxu1 %v1134_v11  ;;  %v284_v28 = vpack.c.bf16 %v257_v26, %v256_v25  ;;  %v260_v31 = vld [vmem:[%s1325_s14 + $0x60] sm:$0xff]  ;;  %v261_v32 = vld [vmem:[%s1325_s14 + $0x68] sm:$0xff]  ;;  %v285_v33 = vpack.c.bf16 %v259_v30, %v258_v29  ;;  %v262_v35 = vld [vmem:[%s1325_s14 + $0x70] sm:$0xff] }
  0x3b   : > { %993 = vmatpush3.bf16.msra.mxu0 %v1127_v2  ;;  %1040 = vmatprep.subr.bf16.mxu1 %v1135_v12  ;;  %v286_v34 = vpack.c.bf16 %v261_v32, %v260_v31  ;;  %v263_v36 = vld [vmem:[%s1325_s14 + $0x78] sm:$0xff]  ;;  %v264_v37 = vld [vmem:[%s1325_s14 + $0x80] sm:$0xff]  ;;  %v265_v38 = vld [vmem:[%s1325_s14 + $0x88] sm:$0xff] }
  0x3c   : > { %994 = vmatprep.subr.bf16.mxu0 %v1128_v3  ;;  %v287_v39 = vpack.c.bf16 %v263_v36, %v262_v35  ;;  %v288_v40 = vpack.c.bf16 %v265_v38, %v264_v37  ;;  %v266_v41 = vld [vmem:[%s1325_s14 + $0x90] sm:$0xff]  ;;  %v267_v42 = vld [vmem:[%s1325_s14 + $0x98] sm:$0xff]  ;;  %v268_v43 = vld [vmem:[%s1325_s14 + $0xa0] sm:$0xff] }
  0x3d   : > { %v269_v44 = vld [vmem:[%s1325_s14 + $0xa8] sm:$0xff]  ;;  %v289_v45 = vpack.c.bf16 %v267_v42, %v266_v41  ;;  %v270_v47 = vld [vmem:[%s1325_s14 + $0xb0] sm:$0xff]  ;;  %v271_v48 = vld [vmem:[%s1325_s14 + $0xb8] sm:$0xff] }
  0x3e   : > { %1041 = vmatpush3.bf16.msra.mxu1 %v1135_v12  ;;  %v290_v46 = vpack.c.bf16 %v269_v44, %v268_v43  ;;  %v272_v49 = vld [vmem:[%s1325_s14 + $0xc0] sm:$0xff]  ;;  %v273_v50 = vld [vmem:[%s1325_s14 + $0xc8] sm:$0xff]  ;;  %v291_v51 = vpack.c.bf16 %v271_v48, %v270_v47  ;;  %v274_v53 = vld [vmem:[%s1325_s14 + $0xd0] sm:$0xff] }
  0x3f   : > { %995 = vmatpush3.bf16.msra.mxu0 %v1128_v3  ;;  %1042 = vmatprep.subr.bf16.mxu1 %v1136_v16  ;;  %v292_v52 = vpack.c.bf16 %v273_v50, %v272_v49  ;;  %v275_v54 = vld [vmem:[%s1325_s14 + $0xd8] sm:$0xff]  ;;  %v276_v55 = vld [vmem:[%s1325_s14 + $0xe0] sm:$0xff]  ;;  %v277_v56 = vld [vmem:[%s1325_s14 + $0xe8] sm:$0xff] }
  0x40   : > { %996 = vmatprep.subr.bf16.mxu0 %v1129_v7  ;;  %v293_v57 = vpack.c.bf16 %v275_v54, %v274_v53  ;;  %v294_v58 = vpack.c.bf16 %v277_v56, %v276_v55  ;;  %v278_v59 = vld [vmem:[%s1325_s14 + $0xf0] sm:$0xff]  ;;  %v279_v60 = vld [vmem:[%s1325_s14 + $0xf8] sm:$0xff]  ;;  %v1414_v0 = vld [vmem:[%s1571_s2] ss:$0 sm:$0xff]  ;;  %s917_s14 = sshll.u32 %s908_s22, 5 }
  0x41   : > { %v295_v61 = vpack.c.bf16 %v279_v60, %v278_v59  ;;  %v1139_v62 = vld [vmem:[%s1572_s3 + $0x30] sm:$0xff]   ;;  %v1140_v63 = vld [vmem:[%s1572_s3 + $0x38] sm:$0xff]   ;;  %p242_p7 = scmp.lt.s32.totalorder %s917_s14, 63 }
  0x42   : > { %1043 = vmatpush3.bf16.msra.mxu1 %v1136_v16 }
  0x43   : > { %997 = vmatpush3.bf16.msra.mxu0 %v1129_v7  ;;  %1044 = vmatprep.subr.bf16.mxu1 %v1137_v21  ;;  %s1583_s14 = smov (!%p242_p7, %s917_s14), 63 }
  0x44   : > { %998 = vmatprep.subr.bf16.mxu0 %v1130_v8  ;;  %s918_s9 = sshll.u32 %s1583_s14, 3 }
  0x45   : > { %s1458_s10 = scalar_lea.vmem %s1574_s5, %s918_s9 }
  0x46   : > { %1045 = vmatpush3.bf16.msra.mxu1 %v1137_v21 }
  0x47   : > { %999 = vmatpush3.bf16.msra.mxu0 %v1130_v8  ;;  %1046 = vmatprep.subr.bf16.mxu1 %v1138_v24 }
  0x48   : > { %1000 = vmatprep.subr.bf16.mxu0 %v1131_v9 }
  0x4a   : > { %1047 = vmatpush3.bf16.msra.mxu1 %v1138_v24 }
  0x4b   : > { %1001 = vmatpush3.bf16.msra.mxu0 %v1131_v9  ;;  %1048 = vmatprep.subr.bf16.mxu1 %v1139_v62 }
  0x4c   : > { %1002 = vmatprep.subr.bf16.mxu0 %v1132_v13 }
  0x4e   : > { %1049 = vmatpush3.bf16.msra.mxu1 %v1139_v62 }
  0x4f   : > { %1003 = vmatpush3.bf16.msra.mxu0 %v1132_v13  ;;  %1050 = vmatprep.subr.bf16.mxu1 %v1140_v63 }
  0x52   : > { %1005 = vmatmul.mubr.bf16.vlgmr.msra.gmra.mrb[0].mxu0 %v281_v19  ;;  %1051 = vmatpush3.bf16.msra.mxu1 %v1140_v63 }
  0x53   : > { %1008 = vmatprep.mubr.bf16.mxu0 %v282_v20 }
  0x5a   : > { %1009 = vmatmul.mubr.bf16.gmra.mrb[4].mxu0 %v283_v27 }
  0x5b   : > { %1012 = vmatprep.mubr.bf16.mxu0 %v284_v28 }
  0x62   : > { %1013 = vmatmul.mubr.bf16.gmra.mrb[8].mxu0 %v285_v33 }
  0x63   : > { %1016 = vmatprep.mubr.bf16.mxu0 %v286_v34 }
  0x6a   : > { %1017 = vmatmul.mubr.bf16.gmra.mrb[12].mxu0 %v287_v39 }
  0x6b   : > { %1020 = vmatprep.mubr.bf16.mxu0 %v288_v40 }
  0x72   : > { %1021 = vmatmul.mubr.bf16.gmra.mrb[16].mxu0 %v289_v45 }
  0x73   : > { %1024 = vmatprep.mubr.bf16.mxu0 %v290_v46 }
  0x7a   : > { %1025 = vmatmul.mubr.bf16.gmra.mrb[20].mxu0 %v291_v51 }
  0x7b   : > { %1028 = vmatprep.mubr.bf16.mxu0 %v292_v52 }
  0x82   : > { %1029 = vmatmul.mubr.bf16.gmra.mrb[24].mxu0 %v293_v57 }
  0x83   : > { %1032 = vmatprep.mubr.bf16.mxu0 %v294_v58 }
  0x8a   : > { %1033 = vmatmul.mubr.bf16.gmra.mrb[28].mxu0 %v295_v61 }
 0x125   : > { %v1006_v1 = vpop.f32.mrb[0].mxu0 }
 0x126   : > { %v410_v2 = vadd.f32 %v1006_v1, %v1414_v0  ;;  %v401_v3 = vpop.f32.mrb[1].mxu0 }
 0x127   : > { %v402_v4 = vadd.f32 %v1414_v0, %v401_v3  ;;  %v1007_v5 = vpop.f32.mrb[2].mxu0 }
 0x128   : > { %v413_v6 = vadd.f32 %v1007_v5, %v1414_v0  ;;  %v404_v7 = vpop.f32.mrb[3].mxu0  ;;  %v530_v9 = vmax.f32 %v410_v2, 0.0 }
 0x129   : > { %v405_v8 = vadd.f32 %v1414_v0, %v404_v7  ;;  %v528_v11 = vmax.f32 %v402_v4, 0.0 }
 0x12a   : > { %v531_v10 = vmax.f32 %v413_v6, 0.0 }
 0x12b   : > { %v529_v12 = vmax.f32 %v405_v8, 0.0 }
 0x12c   : > { %v561_v13 = vpack.c.bf16 %v531_v10, %v530_v9 }
 0x12d   : > { %v1010_v14 = vpop.f32.mrb[4].mxu0  ;;  %v560_v15 = vpack.c.bf16 %v529_v12, %v528_v11 }
 0x12e   : > { %v426_v16 = vadd.f32 %v1010_v14, %v1414_v0  ;;  %v417_v17 = vpop.f32.mrb[5].mxu0 }
 0x12f   : > { %v418_v18 = vadd.f32 %v1414_v0, %v417_v17  ;;  %v1011_v19 = vpop.f32.mrb[6].mxu0  ;;  %1052 = vmatprep.mubr.bf16.mxu1 %v560_v15 }
 0x130   : > { %v429_v20 = vadd.f32 %v1011_v19, %v1414_v0  ;;  %v420_v21 = vpop.f32.mrb[7].mxu0  ;;  %1053 = vmatmul.mubr.bf16.vlgmr.msra.gmra.mrb[0].mxu1 %v561_v13  ;;  %v534_v23 = vmax.f32 %v426_v16, 0.0 }
 0x131   : > { %v421_v22 = vadd.f32 %v1414_v0, %v420_v21  ;;  %v532_v25 = vmax.f32 %v418_v18, 0.0 }
 0x132   : > { %v535_v24 = vmax.f32 %v429_v20, 0.0 }
 0x133   : > { %v533_v26 = vmax.f32 %v421_v22, 0.0 }
 0x134   : > { %v563_v27 = vpack.c.bf16 %v535_v24, %v534_v23 }
 0x135   : > { %v562_v28 = vpack.c.bf16 %v533_v26, %v532_v25  ;;  %v1014_v29 = vpop.f32.mrb[8].mxu0 }
 0x136   : > { %v442_v30 = vadd.f32 %v1014_v29, %v1414_v0  ;;  %v433_v31 = vpop.f32.mrb[9].mxu0 }
 0x137   : > { %v434_v32 = vadd.f32 %v1414_v0, %v433_v31  ;;  %v1015_v33 = vpop.f32.mrb[10].mxu0  ;;  %1056 = vmatprep.mubr.bf16.mxu1 %v562_v28 }
 0x138   : > { %v445_v34 = vadd.f32 %v1015_v33, %v1414_v0  ;;  %v436_v35 = vpop.f32.mrb[11].mxu0  ;;  %1057 = vmatmul.mubr.bf16.gmra.mrb[4].mxu1 %v563_v27  ;;  %v538_v37 = vmax.f32 %v442_v30, 0.0 }
 0x139   : > { %v437_v36 = vadd.f32 %v1414_v0, %v436_v35  ;;  %v536_v39 = vmax.f32 %v434_v32, 0.0 }
 0x13a   : > { %v539_v38 = vmax.f32 %v445_v34, 0.0 }
 0x13b   : > { %v537_v40 = vmax.f32 %v437_v36, 0.0 }
 0x13c   : > { %v565_v41 = vpack.c.bf16 %v539_v38, %v538_v37 }
 0x13d   : > { %v564_v42 = vpack.c.bf16 %v537_v40, %v536_v39  ;;  %v1018_v43 = vpop.f32.mrb[12].mxu0 }
 0x13e   : > { %v458_v44 = vadd.f32 %v1018_v43, %v1414_v0  ;;  %v449_v45 = vpop.f32.mrb[13].mxu0 }
 0x13f   : > { %v450_v46 = vadd.f32 %v1414_v0, %v449_v45  ;;  %v1019_v47 = vpop.f32.mrb[14].mxu0  ;;  %1060 = vmatprep.mubr.bf16.mxu1 %v564_v42 }
 0x140   : > { %v461_v48 = vadd.f32 %v1019_v47, %v1414_v0  ;;  %v452_v49 = vpop.f32.mrb[15].mxu0  ;;  %1061 = vmatmul.mubr.bf16.gmra.mrb[8].mxu1 %v565_v41  ;;  %v542_v51 = vmax.f32 %v458_v44, 0.0 }
 0x141   : > { %v453_v50 = vadd.f32 %v1414_v0, %v452_v49  ;;  %v540_v53 = vmax.f32 %v450_v46, 0.0 }
 0x142   : > { %v543_v52 = vmax.f32 %v461_v48, 0.0 }
 0x143   : > { %v541_v54 = vmax.f32 %v453_v50, 0.0  ;;  %v1453_v50 = vld [vmem:[%s1573_s4] ss:$0 sm:$0xff] }
 0x144   : > { %v567_v55 = vpack.c.bf16 %v543_v52, %v542_v51 }
 0x145   : > { %v566_v56 = vpack.c.bf16 %v541_v54, %v540_v53  ;;  %v1022_v57 = vpop.f32.mrb[16].mxu0 }
 0x146   : > { %v474_v58 = vadd.f32 %v1022_v57, %v1414_v0  ;;  %v465_v59 = vpop.f32.mrb[17].mxu0 }
 0x147   : > { %v466_v60 = vadd.f32 %v1414_v0, %v465_v59  ;;  %v1023_v61 = vpop.f32.mrb[18].mxu0  ;;  %1064 = vmatprep.mubr.bf16.mxu1 %v566_v56 }
 0x148   : > { %v477_v62 = vadd.f32 %v1023_v61, %v1414_v0  ;;  %v468_v63 = vpop.f32.mrb[19].mxu0  ;;  %1065 = vmatmul.mubr.bf16.gmra.mrb[12].mxu1 %v567_v55  ;;  %v546_v2 = vmax.f32 %v474_v58, 0.0 }
 0x149   : > { %v469_v1 = vadd.f32 %v1414_v0, %v468_v63  ;;  %v544_v4 = vmax.f32 %v466_v60, 0.0 }
 0x14a   : > { %v547_v3 = vmax.f32 %v477_v62, 0.0 }
 0x14b   : > { %v545_v5 = vmax.f32 %v469_v1, 0.0 }
 0x14c   : > { %v569_v6 = vpack.c.bf16 %v547_v3, %v546_v2 }
 0x14d   : > { %v568_v7 = vpack.c.bf16 %v545_v5, %v544_v4  ;;  %v1026_v8 = vpop.f32.mrb[20].mxu0 }
 0x14e   : > { %v490_v9 = vadd.f32 %v1026_v8, %v1414_v0  ;;  %v481_v10 = vpop.f32.mrb[21].mxu0 }
 0x14f   : > { %v482_v11 = vadd.f32 %v1414_v0, %v481_v10  ;;  %v1027_v12 = vpop.f32.mrb[22].mxu0  ;;  %1068 = vmatprep.mubr.bf16.mxu1 %v568_v7 }
 0x150   : > { %v493_v13 = vadd.f32 %v1027_v12, %v1414_v0  ;;  %v484_v14 = vpop.f32.mrb[23].mxu0  ;;  %1069 = vmatmul.mubr.bf16.gmra.mrb[16].mxu1 %v569_v6  ;;  %v550_v16 = vmax.f32 %v490_v9, 0.0 }
 0x151   : > { %v485_v15 = vadd.f32 %v1414_v0, %v484_v14  ;;  %v548_v18 = vmax.f32 %v482_v11, 0.0 }
 0x152   : > { %v551_v17 = vmax.f32 %v493_v13, 0.0 }
 0x153   : > { %v549_v19 = vmax.f32 %v485_v15, 0.0 }
 0x154   : > { %v571_v20 = vpack.c.bf16 %v551_v17, %v550_v16 }
 0x155   : > { %v570_v21 = vpack.c.bf16 %v549_v19, %v548_v18  ;;  %v1030_v22 = vpop.f32.mrb[24].mxu0 }
 0x156   : > { %v506_v23 = vadd.f32 %v1030_v22, %v1414_v0  ;;  %v497_v24 = vpop.f32.mrb[25].mxu0 }
 0x157   : > { %v498_v25 = vadd.f32 %v1414_v0, %v497_v24  ;;  %v1031_v26 = vpop.f32.mrb[26].mxu0  ;;  %1072 = vmatprep.mubr.bf16.mxu1 %v570_v21 }
 0x158   : > { %v509_v27 = vadd.f32 %v1031_v26, %v1414_v0  ;;  %v500_v28 = vpop.f32.mrb[27].mxu0  ;;  %1073 = vmatmul.mubr.bf16.gmra.mrb[20].mxu1 %v571_v20  ;;  %v554_v30 = vmax.f32 %v506_v23, 0.0 }
 0x159   : > { %v501_v29 = vadd.f32 %v1414_v0, %v500_v28  ;;  %v552_v32 = vmax.f32 %v498_v25, 0.0 }
 0x15a   : > { %v555_v31 = vmax.f32 %v509_v27, 0.0 }
 0x15b   : > { %v553_v33 = vmax.f32 %v501_v29, 0.0 }
 0x15c   : > { %v573_v34 = vpack.c.bf16 %v555_v31, %v554_v30 }
 0x15d   : > { %v572_v35 = vpack.c.bf16 %v553_v33, %v552_v32  ;;  %v1034_v36 = vpop.f32.mrb[28].mxu0 }
 0x15e   : > { %v522_v37 = vadd.f32 %v1034_v36, %v1414_v0  ;;  %v513_v38 = vpop.f32.mrb[29].mxu0 }
 0x15f   : > { %v514_v39 = vadd.f32 %v1414_v0, %v513_v38  ;;  %v1035_v40 = vpop.f32.mrb[30].mxu0  ;;  %1076 = vmatprep.mubr.bf16.mxu1 %v572_v35 }
 0x160   : > { %v525_v41 = vadd.f32 %v1035_v40, %v1414_v0  ;;  %v516_v42 = vpop.f32.mrb[31].mxu0  ;;  %1077 = vmatmul.mubr.bf16.gmra.mrb[24].mxu1 %v573_v34  ;;  %v558_v44 = vmax.f32 %v522_v37, 0.0 }
 0x161   : > { %v517_v43 = vadd.f32 %v1414_v0, %v516_v42  ;;  %v556_v46 = vmax.f32 %v514_v39, 0.0 }
 0x162   : > { %v559_v45 = vmax.f32 %v525_v41, 0.0 }
 0x163   : > { %v557_v47 = vmax.f32 %v517_v43, 0.0 }
 0x164   : > { %v575_v48 = vpack.c.bf16 %v559_v45, %v558_v44 }
 0x165   : > { %v574_v49 = vpack.c.bf16 %v557_v47, %v556_v46 }
 0x167   : > { %1080 = vmatprep.mubr.bf16.mxu1 %v574_v49 }
 0x168   : > { %1081 = vmatmul.mubr.bf16.gmra.mrb[28].mxu1 %v575_v48 }
 0x203   : > { %v1054_v0 = vpop.f32.mrb[0].mxu1 }
 0x204   : > { %v690_v51 = vadd.f32 %v1054_v0, %v1453_v50  ;;  %v681_v52 = vpop.f32.mrb[1].mxu1 }
 0x205   : > { %v682_v53 = vadd.f32 %v1453_v50, %v681_v52  ;;  %v1055_v54 = vpop.f32.mrb[2].mxu1 }
 0x206   : > { %811 = vst.msk [vmem:[%s1458_s10 + $0x10] sm:$0xff] %vm808_vm0, %v690_v51  ;;  %v693_v55 = vadd.f32 %v1055_v54, %v1453_v50  ;;  %v684_v56 = vpop.f32.mrb[3].mxu1 }
 0x207   : > { %809 = vst.msk [vmem:[%s1458_s10] sm:$0xff] %vm808_vm0, %v682_v53  ;;  %v685_v57 = vadd.f32 %v1453_v50, %v684_v56 }
 0x208   : > { %812 = vst.msk [vmem:[%s1458_s10 + $0x18] sm:$0xff] %vm808_vm0, %v693_v55 }
 0x209   : > { %810 = vst.msk [vmem:[%s1458_s10 + $0x8] sm:$0xff] %vm808_vm0, %v685_v57 }
 0x20b   : > { %v1058_v58 = vpop.f32.mrb[4].mxu1 }
 0x20c   : > { %v706_v59 = vadd.f32 %v1058_v58, %v1453_v50  ;;  %v697_v60 = vpop.f32.mrb[5].mxu1 }
 0x20d   : > { %v698_v61 = vadd.f32 %v1453_v50, %v697_v60  ;;  %v1059_v62 = vpop.f32.mrb[6].mxu1 }
 0x20e   : > { %815 = vst.msk [vmem:[%s1458_s10 + $0x30] sm:$0xff] %vm808_vm0, %v706_v59  ;;  %v709_v63 = vadd.f32 %v1059_v62, %v1453_v50  ;;  %v700_v1 = vpop.f32.mrb[7].mxu1 }
 0x20f   : > { %813 = vst.msk [vmem:[%s1458_s10 + $0x20] sm:$0xff] %vm808_vm0, %v698_v61  ;;  %v701_v2 = vadd.f32 %v1453_v50, %v700_v1 }
 0x210   : > { %816 = vst.msk [vmem:[%s1458_s10 + $0x38] sm:$0xff] %vm808_vm0, %v709_v63 }
 0x211   : > { %814 = vst.msk [vmem:[%s1458_s10 + $0x28] sm:$0xff] %vm808_vm0, %v701_v2 }
 0x213   : > { %v1062_v3 = vpop.f32.mrb[8].mxu1 }
 0x214   : > { %v722_v4 = vadd.f32 %v1062_v3, %v1453_v50  ;;  %v713_v5 = vpop.f32.mrb[9].mxu1 }
 0x215   : > { %v714_v6 = vadd.f32 %v1453_v50, %v713_v5  ;;  %v1063_v7 = vpop.f32.mrb[10].mxu1 }
 0x216   : > { %819 = vst.msk [vmem:[%s1458_s10 + $0x50] sm:$0xff] %vm808_vm0, %v722_v4  ;;  %v725_v8 = vadd.f32 %v1063_v7, %v1453_v50  ;;  %v716_v9 = vpop.f32.mrb[11].mxu1 }
 0x217   : > { %817 = vst.msk [vmem:[%s1458_s10 + $0x40] sm:$0xff] %vm808_vm0, %v714_v6  ;;  %v717_v10 = vadd.f32 %v1453_v50, %v716_v9 }
 0x218   : > { %820 = vst.msk [vmem:[%s1458_s10 + $0x58] sm:$0xff] %vm808_vm0, %v725_v8 }
 0x219   : > { %818 = vst.msk [vmem:[%s1458_s10 + $0x48] sm:$0xff] %vm808_vm0, %v717_v10 }
 0x21b   : > { %v1066_v11 = vpop.f32.mrb[12].mxu1 }
 0x21c   : > { %v738_v12 = vadd.f32 %v1066_v11, %v1453_v50  ;;  %v729_v13 = vpop.f32.mrb[13].mxu1 }
 0x21d   : > { %v730_v14 = vadd.f32 %v1453_v50, %v729_v13  ;;  %v1067_v15 = vpop.f32.mrb[14].mxu1 }
 0x21e   : > { %823 = vst.msk [vmem:[%s1458_s10 + $0x70] sm:$0xff] %vm808_vm0, %v738_v12  ;;  %v741_v16 = vadd.f32 %v1067_v15, %v1453_v50  ;;  %v732_v17 = vpop.f32.mrb[15].mxu1 }
 0x21f   : > { %821 = vst.msk [vmem:[%s1458_s10 + $0x60] sm:$0xff] %vm808_vm0, %v730_v14  ;;  %v733_v18 = vadd.f32 %v1453_v50, %v732_v17 }
 0x220   : > { %824 = vst.msk [vmem:[%s1458_s10 + $0x78] sm:$0xff] %vm808_vm0, %v741_v16 }
 0x221   : > { %822 = vst.msk [vmem:[%s1458_s10 + $0x68] sm:$0xff] %vm808_vm0, %v733_v18 }
 0x223   : > { %v1070_v19 = vpop.f32.mrb[16].mxu1 }
 0x224   : > { %v754_v20 = vadd.f32 %v1070_v19, %v1453_v50  ;;  %v745_v21 = vpop.f32.mrb[17].mxu1 }
 0x225   : > { %v746_v22 = vadd.f32 %v1453_v50, %v745_v21  ;;  %v1071_v23 = vpop.f32.mrb[18].mxu1 }
 0x226   : > { %827 = vst.msk [vmem:[%s1458_s10 + $0x90] sm:$0xff] %vm808_vm0, %v754_v20  ;;  %v757_v24 = vadd.f32 %v1071_v23, %v1453_v50  ;;  %v748_v25 = vpop.f32.mrb[19].mxu1 }
 0x227   : > { %825 = vst.msk [vmem:[%s1458_s10 + $0x80] sm:$0xff] %vm808_vm0, %v746_v22  ;;  %v749_v26 = vadd.f32 %v1453_v50, %v748_v25 }
 0x228   : > { %828 = vst.msk [vmem:[%s1458_s10 + $0x98] sm:$0xff] %vm808_vm0, %v757_v24 }
 0x229   : > { %826 = vst.msk [vmem:[%s1458_s10 + $0x88] sm:$0xff] %vm808_vm0, %v749_v26 }
 0x22b   : > { %v1074_v27 = vpop.f32.mrb[20].mxu1 }
 0x22c   : > { %v770_v28 = vadd.f32 %v1074_v27, %v1453_v50  ;;  %v761_v29 = vpop.f32.mrb[21].mxu1 }
 0x22d   : > { %v762_v30 = vadd.f32 %v1453_v50, %v761_v29  ;;  %v1075_v31 = vpop.f32.mrb[22].mxu1 }
 0x22e   : > { %831 = vst.msk [vmem:[%s1458_s10 + $0xb0] sm:$0xff] %vm808_vm0, %v770_v28  ;;  %v773_v32 = vadd.f32 %v1075_v31, %v1453_v50  ;;  %v764_v33 = vpop.f32.mrb[23].mxu1 }
 0x22f   : > { %829 = vst.msk [vmem:[%s1458_s10 + $0xa0] sm:$0xff] %vm808_vm0, %v762_v30  ;;  %v765_v34 = vadd.f32 %v1453_v50, %v764_v33 }
 0x230   : > { %832 = vst.msk [vmem:[%s1458_s10 + $0xb8] sm:$0xff] %vm808_vm0, %v773_v32 }
 0x231   : > { %830 = vst.msk [vmem:[%s1458_s10 + $0xa8] sm:$0xff] %vm808_vm0, %v765_v34 }
 0x233   : > { %v1078_v35 = vpop.f32.mrb[24].mxu1 }
 0x234   : > { %v786_v36 = vadd.f32 %v1078_v35, %v1453_v50  ;;  %v777_v37 = vpop.f32.mrb[25].mxu1 }
 0x235   : > { %v778_v38 = vadd.f32 %v1453_v50, %v777_v37  ;;  %v1079_v39 = vpop.f32.mrb[26].mxu1 }
 0x236   : > { %835 = vst.msk [vmem:[%s1458_s10 + $0xd0] sm:$0xff] %vm808_vm0, %v786_v36  ;;  %v789_v40 = vadd.f32 %v1079_v39, %v1453_v50  ;;  %v780_v41 = vpop.f32.mrb[27].mxu1 }
 0x237   : > { %833 = vst.msk [vmem:[%s1458_s10 + $0xc0] sm:$0xff] %vm808_vm0, %v778_v38  ;;  %v781_v42 = vadd.f32 %v1453_v50, %v780_v41 }
 0x238   : > { %836 = vst.msk [vmem:[%s1458_s10 + $0xd8] sm:$0xff] %vm808_vm0, %v789_v40 }
 0x239   : > { %834 = vst.msk [vmem:[%s1458_s10 + $0xc8] sm:$0xff] %vm808_vm0, %v781_v42 }
 0x23b   : > { %v1082_v43 = vpop.f32.mrb[28].mxu1 }
 0x23c   : > { %v802_v44 = vadd.f32 %v1082_v43, %v1453_v50  ;;  %v793_v45 = vpop.f32.mrb[29].mxu1 }
 0x23d   : > { %v794_v46 = vadd.f32 %v1453_v50, %v793_v45  ;;  %v1083_v47 = vpop.f32.mrb[30].mxu1 }
 0x23e   : > { %839 = vst.msk [vmem:[%s1458_s10 + $0xf0] sm:$0xff] %vm808_vm0, %v802_v44  ;;  %v805_v48 = vadd.f32 %v1083_v47, %v1453_v50  ;;  %v796_v49 = vpop.f32.mrb[31].mxu1 }
 0x23f   : > { %837 = vst.msk [vmem:[%s1458_s10 + $0xe0] sm:$0xff] %vm808_vm0, %v794_v46  ;;  %v797_v0 = vadd.f32 %v1453_v50, %v796_v49 }
 0x240   : > { %840 = vst.msk [vmem:[%s1458_s10 + $0xf8] sm:$0xff] %vm808_vm0, %v805_v48 }
 0x241   : > { %838 = vst.msk [vmem:[%s1458_s10 + $0xe8] sm:$0xff] %vm808_vm0, %v797_v0 }
 0x242 PF: > { %p15_p8 = scmp.ge.s32.totalorder %s1260_s23, 4   ;;  %s1578_s18 = smov %s1197_s19 }
 0x243   : > { %s1579_s19 = smov %s1201_s20  ;;  %s1580_s20 = smov %s1270_s26 }
 0x244   : > { %s1581_s21 = smov %s1260_s23  ;;  %17 = sbr.rel (!%p15_p8) target bundleno = 3 (0x3), region = 80 }
 0x24b   :  { %863 = vsyncpa [#allocation3], 1 }
 0x24c   :  { %865 = vsyncpa [#allocation3 + $0x1], 1 }

</bundles_post_ra>
